<compile_context>
chip_gen: v7x
topology: tpu7x:2x2x1
jax: 0.10.0
libtpu: 0.0.40
codegen_flags: <defaults>
</compile_context>

<pallas_src>
import math
import functools

import jax
import jax.numpy as jnp
from jax.experimental import pallas as pl
from jax.experimental.pallas import tpu as pltpu


# ----------------------------- Pallas kernel ---------------------------------

def seq2seq_kernel(x_ref,        # (T, B, 1)   encoder input sequence
                   ewih_ref,     # (1, 4H)     encoder W_ih^T   (gate order [i,f,o,g])
                   ewhh_ref,     # (H, 4H)     encoder W_hh^T
                   eb_ref,       # (1, 4H)     encoder bias_ih + bias_hh
                   h0_ref,       # (B, H)      initial hidden (broadcast h0 param)
                   c0_ref,       # (B, H)      initial cell   (broadcast c0 param)
                   dwih_ref,     # (1, 4H)     decoder LSTMCell W_ih^T
                   dwhh_ref,     # (H, 4H)     decoder LSTMCell W_hh^T
                   db_ref,       # (1, 4H)     decoder bias_ih + bias_hh
                   wfused_ref,   # (H, 4H)     dwhh + w_out @ dwih
                   bfused_ref,   # (1, 4H)     db   + b_out @ dwih
                   wout_ref,     # (1, H)      readout Linear weight (row)
                   bout_ref,     # (1, 1)      readout Linear bias
                   out_ref,      # (PRED, B)
                   hstack_ref):  # scratch (PRED, B, H)
    T, B, D = x_ref.shape
    H = h0_ref.shape[1]
    PRED = out_ref.shape[0]

    x = x_ref[...]                 # (T, B, 1)
    ewhh = ewhh_ref[...]
    dwhh = dwhh_ref[...]
    wfused = wfused_ref[...]
    bfused = bfused_ref[...]

    def activations(gates, c):
        # gate order [i, f, o, g]: one contiguous sigmoid slab + one tanh slab.
        s = jax.nn.sigmoid(gates[:, :3 * H])
        g_g = jnp.tanh(gates[:, 3 * H:])
        i_g = s[:, 0 * H:1 * H]
        f_g = s[:, 1 * H:2 * H]
        o_g = s[:, 2 * H:3 * H]
        c_new = f_g * c + i_g * g_g
        h_new = o_g * jnp.tanh(c_new)
        return h_new, c_new

    # ---- Encoder: input projection hoisted out of the loop (D == 1 -> VPU bcast) ----
    xproj = x * ewih_ref[...] + eb_ref[...]          # (T, B, 4H)

    h = h0_ref[...]
    c = c0_ref[...]
    for t in range(T):                               # T small -> static unroll
        gates = xproj[t] + jnp.dot(h, ewhh, preferred_element_type=jnp.float32)
        h, c = activations(gates, c)

    # ---- Decoder step 0: dec_in = input_seq[:, -1, :]  (D == 1 -> VPU bcast) ----
    gates = (x[T - 1] * dwih_ref[...] + db_ref[...]
             + jnp.dot(h, dwhh, preferred_element_type=jnp.float32))
    h, c = activations(gates, c)
    hstack_ref[0] = h

    # ---- Decoder steps 1..PRED-1: readout feedback fused into the recurrence ----
    for t in range(1, PRED):
        gates = jnp.dot(h, wfused, preferred_element_type=jnp.float32) + bfused
        h, c = activations(gates, c)
        hstack_ref[t] = h

    # ---- Batched readout, off the recurrence (N = 1 -> VPU mul + lane reduce) ----
    hstack = hstack_ref[...]                          # (PRED, B, H)
    o = jnp.sum(hstack * wout_ref[...], axis=-1)      # (PRED, B)
    out_ref[...] = o + bout_ref[...]                  # (1,1) bias broadcasts


# ------------------------------ Wrapper ---------------------------------------

@functools.partial(jax.jit, static_argnames=("pred_len",))
def seq2seq_forward(x, params, pred_len):
    """x: (B, T, D) float32. Returns (B, pred_len, 1) like the PyTorch module."""
    B, T, D = x.shape
    H = params["enc_whh"].shape[0]
    # Decoder feedback (dec_input = readout) only type-checks when
    # input_dim == rnn_num_layers == 1, same as the original module.
    assert D == 1 and params["w_out"].shape == (H, 1), \
        "Seq2SeqEncDec decoder feedback requires input_dim == rnn_num_layers == 1"

    def reorder(w):  # PyTorch gate order [i, f, g, o] -> [i, f, o, g]
        i, f, g, o = jnp.split(w, 4, axis=-1)
        return jnp.concatenate([i, f, o, g], axis=-1)

    enc_wih = reorder(params["enc_wih"])
    enc_whh = reorder(params["enc_whh"])
    enc_b = reorder(params["enc_b"])
    dec_wih = reorder(params["dec_wih"])
    dec_whh = reorder(params["dec_whh"])
    dec_b = reorder(params["dec_b"])
    w_out = params["w_out"]                     # (H, 1)
    b_out = params["b_out"]                     # (1, 1)

    # Fold the (N=1) readout feedback into the decoder recurrence weights.
    w_fused = dec_whh + w_out @ dec_wih         # (H, 4H)
    b_fused = dec_b + b_out @ dec_wih           # (1, 4H)

    x_tbd = jnp.transpose(x, (1, 0, 2))         # (T, B, D)
    h0 = jnp.broadcast_to(params["h0"], (B, H))
    c0 = jnp.broadcast_to(params["c0"], (B, H))

    vmem = lambda: pl.BlockSpec(memory_space=pltpu.MemorySpace.VMEM)
    out_pb = pl.pallas_call(
        seq2seq_kernel,
        out_shape=jax.ShapeDtypeStruct((pred_len, B), jnp.float32),
        in_specs=[vmem() for _ in range(13)],
        out_specs=vmem(),
        scratch_shapes=[pltpu.VMEM((pred_len, B, H), jnp.float32)],
        compiler_params=pltpu.CompilerParams(vmem_limit_bytes=32 << 20),
    )(x_tbd, enc_wih, enc_whh, enc_b, h0, c0,
      dec_wih, dec_whh, dec_b, w_fused, b_fused, w_out.T, b_out)

    return jnp.transpose(out_pb)[:, :, None]    # (B, pred_len, 1)


# --------------------------- Pure-JAX reference --------------------------------

def seq2seq_reference(x, params, pred_len):
    B, T, D = x.shape
    H = params["enc_whh"].shape[0]
    h = jnp.broadcast_to(params["h0"], (B, H))
    c = jnp.broadcast_to(params["c0"], (B, H))

    def step(x_t, h, c, wih, whh, b):
        g = x_t @ wih + h @ whh + b
        i = jax.nn.sigmoid(g[:, 0 * H:1 * H])
        f = jax.nn.sigmoid(g[:, 1 * H:2 * H])
        gg = jnp.tanh(g[:, 2 * H:3 * H])
        o = jax.nn.sigmoid(g[:, 3 * H:4 * H])
        c_new = f * c + i * gg
        return o * jnp.tanh(c_new), c_new

    for t in range(T):
        h, c = step(x[:, t, :], h, c, params["enc_wih"], params["enc_whh"], params["enc_b"])

    dec_in = x[:, -1, :]
    outs = []
    for _ in range(pred_len):
        h, c = step(dec_in, h, c, params["dec_wih"], params["dec_whh"], params["dec_b"])
        o = h @ params["w_out"] + params["b_out"]
        outs.append(o)
        dec_in = o
    return jnp.concatenate(outs, axis=1)[:, :, None]


# ------------------------------- Main ------------------------------------------

def init_params(key, input_dim, hidden_size):
    """Deterministic synthetic init mirroring PyTorch shapes (transposed for x @ W)."""
    D, H = input_dim, hidden_size
    scale = 1.0 / math.sqrt(H)
    ks = jax.random.split(key, 10)
    u = lambda k, shape: jax.random.uniform(k, shape, jnp.float32, -scale, scale)
    return {
        # Encoder nn.LSTM(num_layers=1), PyTorch gate order [i, f, g, o]
        "enc_wih": u(ks[0], (D, 4 * H)),          # weight_ih_l0^T
        "enc_whh": u(ks[1], (H, 4 * H)),          # weight_hh_l0^T
        "enc_b":   u(ks[2], (1, 4 * H)) + u(ks[3], (1, 4 * H)),   # bias_ih + bias_hh
        "h0": jnp.zeros((1, H), jnp.float32),     # nn.Parameter zeros
        "c0": jnp.zeros((1, H), jnp.float32),
        # DecoderCell nn.LSTMCell
        "dec_wih": u(ks[4], (D, 4 * H)),
        "dec_whh": u(ks[5], (H, 4 * H)),
        "dec_b":   u(ks[6], (1, 4 * H)) + u(ks[7], (1, 4 * H)),
        # DecoderCell nn.Linear(hidden_size, rnn_num_layers=1)
        "w_out": u(ks[8], (H, 1)),
        "b_out": u(ks[9], (1, 1)),
    }


if __name__ == "__main__":
    # Small shapes consistent with the module's forward:
    # input_dim == rnn_num_layers == 1 (required for decoder feedback / squeeze(0)).
    B, input_len, input_dim = 2, 8, 1
    hidden_size, pred_len = 32, 4

    key = jax.random.PRNGKey(0)
    k_params, k_x = jax.random.split(key)
    params = init_params(k_params, input_dim, hidden_size)
    x = jax.random.normal(k_x, (B, input_len, input_dim), jnp.float32)

    out = seq2seq_forward(x, params, pred_len)
    out = jax.block_until_ready(out)

    ref = seq2seq_reference(x, params, pred_len)
    assert out.shape == (B, pred_len, 1), out.shape
    assert jnp.allclose(out, ref, atol=2e-5, rtol=1e-5), (out, ref)

    print("KERNEL_OK")
</pallas_src>

<mosaic_0001>
module attributes {stable_mosaic.version = 11 : i64} {
  func.func @seq2seq_kernel(%arg0: memref<8x2x1xf32, #tpu.memory_space<vmem>>, %arg1: memref<1x128xf32, #tpu.memory_space<vmem>>, %arg2: memref<32x128xf32, #tpu.memory_space<vmem>>, %arg3: memref<1x128xf32, #tpu.memory_space<vmem>>, %arg4: memref<2x32xf32, #tpu.memory_space<vmem>>, %arg5: memref<2x32xf32, #tpu.memory_space<vmem>>, %arg6: memref<1x128xf32, #tpu.memory_space<vmem>>, %arg7: memref<32x128xf32, #tpu.memory_space<vmem>>, %arg8: memref<1x128xf32, #tpu.memory_space<vmem>>, %arg9: memref<32x128xf32, #tpu.memory_space<vmem>>, %arg10: memref<1x128xf32, #tpu.memory_space<vmem>>, %arg11: memref<1x32xf32, #tpu.memory_space<vmem>>, %arg12: memref<1x1xf32, #tpu.memory_space<vmem>>, %arg13: memref<4x2xf32, #tpu.memory_space<vmem>>, %arg14: memref<4x2x32xf32, #tpu.memory_space<vmem>>) attributes {dimension_semantics = [], scalar_prefetch = 0 : i64, scratch_operands = 1 : i64, tpu.core_type = #tpu.core_type<tc>} {
    %c0 = arith.constant 0 : index
    %c0_0 = arith.constant 0 : index
    %c0_1 = arith.constant 0 : index
    %0 = vector.load %arg0[%c0, %c0_0, %c0_1] : memref<8x2x1xf32, #tpu.memory_space<vmem>>, vector<8x2x1xf32>
    %c0_2 = arith.constant 0 : index
    %c0_3 = arith.constant 0 : index
    %1 = vector.load %arg2[%c0_2, %c0_3] : memref<32x128xf32, #tpu.memory_space<vmem>>, vector<32x128xf32>
    %c0_4 = arith.constant 0 : index
    %c0_5 = arith.constant 0 : index
    %2 = vector.load %arg7[%c0_4, %c0_5] : memref<32x128xf32, #tpu.memory_space<vmem>>, vector<32x128xf32>
    %c0_6 = arith.constant 0 : index
    %c0_7 = arith.constant 0 : index
    %3 = vector.load %arg9[%c0_6, %c0_7] : memref<32x128xf32, #tpu.memory_space<vmem>>, vector<32x128xf32>
    %c0_8 = arith.constant 0 : index
    %c0_9 = arith.constant 0 : index
    %4 = vector.load %arg10[%c0_8, %c0_9] : memref<1x128xf32, #tpu.memory_space<vmem>>, vector<1x128xf32>
    %c0_10 = arith.constant 0 : index
    %c0_11 = arith.constant 0 : index
    %5 = vector.load %arg1[%c0_10, %c0_11] : memref<1x128xf32, #tpu.memory_space<vmem>>, vector<1x128xf32>
    %6 = vector.shape_cast %5 : vector<1x128xf32> to vector<1x1x128xf32>
    %7 = vector.broadcast %0 : vector<8x2x1xf32> to vector<8x2x128xf32>
    %8 = vector.broadcast %6 : vector<1x1x128xf32> to vector<8x2x128xf32>
    %9 = arith.mulf %7, %8 : vector<8x2x128xf32>
    %c0_12 = arith.constant 0 : index
    %c0_13 = arith.constant 0 : index
    %10 = vector.load %arg3[%c0_12, %c0_13] : memref<1x128xf32, #tpu.memory_space<vmem>>, vector<1x128xf32>
    %11 = vector.shape_cast %10 : vector<1x128xf32> to vector<1x1x128xf32>
    %12 = vector.broadcast %11 : vector<1x1x128xf32> to vector<8x2x128xf32>
    %13 = arith.addf %9, %12 : vector<8x2x128xf32>
    %c0_14 = arith.constant 0 : index
    %c0_15 = arith.constant 0 : index
    %14 = vector.load %arg4[%c0_14, %c0_15] : memref<2x32xf32, #tpu.memory_space<vmem>>, vector<2x32xf32>
    %c0_16 = arith.constant 0 : index
    %c0_17 = arith.constant 0 : index
    %15 = vector.load %arg5[%c0_16, %c0_17] : memref<2x32xf32, #tpu.memory_space<vmem>>, vector<2x32xf32>
    %16 = vector.extract_strided_slice %13 {offsets = [0, 0, 0], sizes = [1, 2, 128], strides = [1, 1, 1]} : vector<8x2x128xf32> to vector<1x2x128xf32>
    %17 = vector.shape_cast %16 : vector<1x2x128xf32> to vector<2x128xf32>
    %cst = arith.constant dense<0.000000e+00> : vector<2x128xf32>
    %18 = tpu.matmul %14, %1, %cst {dimension_numbers = #tpu.dot_dimension_numbers<[1], [0], [0], [1], [0, 0, 1, 1], [], []>} : vector<2x32xf32>, vector<32x128xf32>, vector<2x128xf32> -> vector<2x128xf32>
    %19 = arith.addf %17, %18 : vector<2x128xf32>
    %20 = vector.extract_strided_slice %19 {offsets = [0, 0], sizes = [2, 96], strides = [1, 1]} : vector<2x128xf32> to vector<2x96xf32>
    %21 = arith.negf %20 : vector<2x96xf32>
    %22 = math.exp %21 : vector<2x96xf32>
    %cst_18 = arith.constant 1.000000e+00 : f32
    %23 = vector.broadcast %cst_18 : f32 to vector<2x96xf32>
    %24 = arith.addf %23, %22 : vector<2x96xf32>
    %25 = arith.divf %23, %24 : vector<2x96xf32>
    %26 = vector.extract_strided_slice %19 {offsets = [0, 96], sizes = [2, 32], strides = [1, 1]} : vector<2x128xf32> to vector<2x32xf32>
    %27 = math.tanh %26 : vector<2x32xf32>
    %28 = vector.extract_strided_slice %25 {offsets = [0, 0], sizes = [2, 32], strides = [1, 1]} : vector<2x96xf32> to vector<2x32xf32>
    %29 = vector.extract_strided_slice %25 {offsets = [0, 32], sizes = [2, 32], strides = [1, 1]} : vector<2x96xf32> to vector<2x32xf32>
    %30 = vector.extract_strided_slice %25 {offsets = [0, 64], sizes = [2, 32], strides = [1, 1]} : vector<2x96xf32> to vector<2x32xf32>
    %31 = arith.mulf %29, %15 : vector<2x32xf32>
    %32 = arith.mulf %28, %27 : vector<2x32xf32>
    %33 = arith.addf %31, %32 : vector<2x32xf32>
    %34 = math.tanh %33 : vector<2x32xf32>
    %35 = arith.mulf %30, %34 : vector<2x32xf32>
    %36 = vector.extract_strided_slice %13 {offsets = [1, 0, 0], sizes = [1, 2, 128], strides = [1, 1, 1]} : vector<8x2x128xf32> to vector<1x2x128xf32>
    %37 = vector.shape_cast %36 : vector<1x2x128xf32> to vector<2x128xf32>
    %cst_19 = arith.constant dense<0.000000e+00> : vector<2x128xf32>
    %38 = tpu.matmul %35, %1, %cst_19 {dimension_numbers = #tpu.dot_dimension_numbers<[1], [0], [0], [1], [0, 0, 1, 1], [], []>} : vector<2x32xf32>, vector<32x128xf32>, vector<2x128xf32> -> vector<2x128xf32>
    %39 = arith.addf %37, %38 : vector<2x128xf32>
    %40 = vector.extract_strided_slice %39 {offsets = [0, 0], sizes = [2, 96], strides = [1, 1]} : vector<2x128xf32> to vector<2x96xf32>
    %41 = arith.negf %40 : vector<2x96xf32>
    %42 = math.exp %41 : vector<2x96xf32>
    %cst_20 = arith.constant 1.000000e+00 : f32
    %43 = vector.broadcast %cst_20 : f32 to vector<2x96xf32>
    %44 = arith.addf %43, %42 : vector<2x96xf32>
    %45 = arith.divf %43, %44 : vector<2x96xf32>
    %46 = vector.extract_strided_slice %39 {offsets = [0, 96], sizes = [2, 32], strides = [1, 1]} : vector<2x128xf32> to vector<2x32xf32>
    %47 = math.tanh %46 : vector<2x32xf32>
    %48 = vector.extract_strided_slice %45 {offsets = [0, 0], sizes = [2, 32], strides = [1, 1]} : vector<2x96xf32> to vector<2x32xf32>
    %49 = vector.extract_strided_slice %45 {offsets = [0, 32], sizes = [2, 32], strides = [1, 1]} : vector<2x96xf32> to vector<2x32xf32>
    %50 = vector.extract_strided_slice %45 {offsets = [0, 64], sizes = [2, 32], strides = [1, 1]} : vector<2x96xf32> to vector<2x32xf32>
    %51 = arith.mulf %49, %33 : vector<2x32xf32>
    %52 = arith.mulf %48, %47 : vector<2x32xf32>
    %53 = arith.addf %51, %52 : vector<2x32xf32>
    %54 = math.tanh %53 : vector<2x32xf32>
    %55 = arith.mulf %50, %54 : vector<2x32xf32>
    %56 = vector.extract_strided_slice %13 {offsets = [2, 0, 0], sizes = [1, 2, 128], strides = [1, 1, 1]} : vector<8x2x128xf32> to vector<1x2x128xf32>
    %57 = vector.shape_cast %56 : vector<1x2x128xf32> to vector<2x128xf32>
    %cst_21 = arith.constant dense<0.000000e+00> : vector<2x128xf32>
    %58 = tpu.matmul %55, %1, %cst_21 {dimension_numbers = #tpu.dot_dimension_numbers<[1], [0], [0], [1], [0, 0, 1, 1], [], []>} : vector<2x32xf32>, vector<32x128xf32>, vector<2x128xf32> -> vector<2x128xf32>
    %59 = arith.addf %57, %58 : vector<2x128xf32>
    %60 = vector.extract_strided_slice %59 {offsets = [0, 0], sizes = [2, 96], strides = [1, 1]} : vector<2x128xf32> to vector<2x96xf32>
    %61 = arith.negf %60 : vector<2x96xf32>
    %62 = math.exp %61 : vector<2x96xf32>
    %cst_22 = arith.constant 1.000000e+00 : f32
    %63 = vector.broadcast %cst_22 : f32 to vector<2x96xf32>
    %64 = arith.addf %63, %62 : vector<2x96xf32>
    %65 = arith.divf %63, %64 : vector<2x96xf32>
    %66 = vector.extract_strided_slice %59 {offsets = [0, 96], sizes = [2, 32], strides = [1, 1]} : vector<2x128xf32> to vector<2x32xf32>
    %67 = math.tanh %66 : vector<2x32xf32>
    %68 = vector.extract_strided_slice %65 {offsets = [0, 0], sizes = [2, 32], strides = [1, 1]} : vector<2x96xf32> to vector<2x32xf32>
    %69 = vector.extract_strided_slice %65 {offsets = [0, 32], sizes = [2, 32], strides = [1, 1]} : vector<2x96xf32> to vector<2x32xf32>
    %70 = vector.extract_strided_slice %65 {offsets = [0, 64], sizes = [2, 32], strides = [1, 1]} : vector<2x96xf32> to vector<2x32xf32>
    %71 = arith.mulf %69, %53 : vector<2x32xf32>
    %72 = arith.mulf %68, %67 : vector<2x32xf32>
    %73 = arith.addf %71, %72 : vector<2x32xf32>
    %74 = math.tanh %73 : vector<2x32xf32>
    %75 = arith.mulf %70, %74 : vector<2x32xf32>
    %76 = vector.extract_strided_slice %13 {offsets = [3, 0, 0], sizes = [1, 2, 128], strides = [1, 1, 1]} : vector<8x2x128xf32> to vector<1x2x128xf32>
    %77 = vector.shape_cast %76 : vector<1x2x128xf32> to vector<2x128xf32>
    %cst_23 = arith.constant dense<0.000000e+00> : vector<2x128xf32>
    %78 = tpu.matmul %75, %1, %cst_23 {dimension_numbers = #tpu.dot_dimension_numbers<[1], [0], [0], [1], [0, 0, 1, 1], [], []>} : vector<2x32xf32>, vector<32x128xf32>, vector<2x128xf32> -> vector<2x128xf32>
    %79 = arith.addf %77, %78 : vector<2x128xf32>
    %80 = vector.extract_strided_slice %79 {offsets = [0, 0], sizes = [2, 96], strides = [1, 1]} : vector<2x128xf32> to vector<2x96xf32>
    %81 = arith.negf %80 : vector<2x96xf32>
    %82 = math.exp %81 : vector<2x96xf32>
    %cst_24 = arith.constant 1.000000e+00 : f32
    %83 = vector.broadcast %cst_24 : f32 to vector<2x96xf32>
    %84 = arith.addf %83, %82 : vector<2x96xf32>
    %85 = arith.divf %83, %84 : vector<2x96xf32>
    %86 = vector.extract_strided_slice %79 {offsets = [0, 96], sizes = [2, 32], strides = [1, 1]} : vector<2x128xf32> to vector<2x32xf32>
    %87 = math.tanh %86 : vector<2x32xf32>
    %88 = vector.extract_strided_slice %85 {offsets = [0, 0], sizes = [2, 32], strides = [1, 1]} : vector<2x96xf32> to vector<2x32xf32>
    %89 = vector.extract_strided_slice %85 {offsets = [0, 32], sizes = [2, 32], strides = [1, 1]} : vector<2x96xf32> to vector<2x32xf32>
    %90 = vector.extract_strided_slice %85 {offsets = [0, 64], sizes = [2, 32], strides = [1, 1]} : vector<2x96xf32> to vector<2x32xf32>
    %91 = arith.mulf %89, %73 : vector<2x32xf32>
    %92 = arith.mulf %88, %87 : vector<2x32xf32>
    %93 = arith.addf %91, %92 : vector<2x32xf32>
    %94 = math.tanh %93 : vector<2x32xf32>
    %95 = arith.mulf %90, %94 : vector<2x32xf32>
    %96 = vector.extract_strided_slice %13 {offsets = [4, 0, 0], sizes = [1, 2, 128], strides = [1, 1, 1]} : vector<8x2x128xf32> to vector<1x2x128xf32>
    %97 = vector.shape_cast %96 : vector<1x2x128xf32> to vector<2x128xf32>
    %cst_25 = arith.constant dense<0.000000e+00> : vector<2x128xf32>
    %98 = tpu.matmul %95, %1, %cst_25 {dimension_numbers = #tpu.dot_dimension_numbers<[1], [0], [0], [1], [0, 0, 1, 1], [], []>} : vector<2x32xf32>, vector<32x128xf32>, vector<2x128xf32> -> vector<2x128xf32>
    %99 = arith.addf %97, %98 : vector<2x128xf32>
    %100 = vector.extract_strided_slice %99 {offsets = [0, 0], sizes = [2, 96], strides = [1, 1]} : vector<2x128xf32> to vector<2x96xf32>
    %101 = arith.negf %100 : vector<2x96xf32>
    %102 = math.exp %101 : vector<2x96xf32>
    %cst_26 = arith.constant 1.000000e+00 : f32
    %103 = vector.broadcast %cst_26 : f32 to vector<2x96xf32>
    %104 = arith.addf %103, %102 : vector<2x96xf32>
    %105 = arith.divf %103, %104 : vector<2x96xf32>
    %106 = vector.extract_strided_slice %99 {offsets = [0, 96], sizes = [2, 32], strides = [1, 1]} : vector<2x128xf32> to vector<2x32xf32>
    %107 = math.tanh %106 : vector<2x32xf32>
    %108 = vector.extract_strided_slice %105 {offsets = [0, 0], sizes = [2, 32], strides = [1, 1]} : vector<2x96xf32> to vector<2x32xf32>
    %109 = vector.extract_strided_slice %105 {offsets = [0, 32], sizes = [2, 32], strides = [1, 1]} : vector<2x96xf32> to vector<2x32xf32>
    %110 = vector.extract_strided_slice %105 {offsets = [0, 64], sizes = [2, 32], strides = [1, 1]} : vector<2x96xf32> to vector<2x32xf32>
    %111 = arith.mulf %109, %93 : vector<2x32xf32>
    %112 = arith.mulf %108, %107 : vector<2x32xf32>
    %113 = arith.addf %111, %112 : vector<2x32xf32>
    %114 = math.tanh %113 : vector<2x32xf32>
    %115 = arith.mulf %110, %114 : vector<2x32xf32>
    %116 = vector.extract_strided_slice %13 {offsets = [5, 0, 0], sizes = [1, 2, 128], strides = [1, 1, 1]} : vector<8x2x128xf32> to vector<1x2x128xf32>
    %117 = vector.shape_cast %116 : vector<1x2x128xf32> to vector<2x128xf32>
    %cst_27 = arith.constant dense<0.000000e+00> : vector<2x128xf32>
    %118 = tpu.matmul %115, %1, %cst_27 {dimension_numbers = #tpu.dot_dimension_numbers<[1], [0], [0], [1], [0, 0, 1, 1], [], []>} : vector<2x32xf32>, vector<32x128xf32>, vector<2x128xf32> -> vector<2x128xf32>
    %119 = arith.addf %117, %118 : vector<2x128xf32>
    %120 = vector.extract_strided_slice %119 {offsets = [0, 0], sizes = [2, 96], strides = [1, 1]} : vector<2x128xf32> to vector<2x96xf32>
    %121 = arith.negf %120 : vector<2x96xf32>
    %122 = math.exp %121 : vector<2x96xf32>
    %cst_28 = arith.constant 1.000000e+00 : f32
    %123 = vector.broadcast %cst_28 : f32 to vector<2x96xf32>
    %124 = arith.addf %123, %122 : vector<2x96xf32>
    %125 = arith.divf %123, %124 : vector<2x96xf32>
    %126 = vector.extract_strided_slice %119 {offsets = [0, 96], sizes = [2, 32], strides = [1, 1]} : vector<2x128xf32> to vector<2x32xf32>
    %127 = math.tanh %126 : vector<2x32xf32>
    %128 = vector.extract_strided_slice %125 {offsets = [0, 0], sizes = [2, 32], strides = [1, 1]} : vector<2x96xf32> to vector<2x32xf32>
    %129 = vector.extract_strided_slice %125 {offsets = [0, 32], sizes = [2, 32], strides = [1, 1]} : vector<2x96xf32> to vector<2x32xf32>
    %130 = vector.extract_strided_slice %125 {offsets = [0, 64], sizes = [2, 32], strides = [1, 1]} : vector<2x96xf32> to vector<2x32xf32>
    %131 = arith.mulf %129, %113 : vector<2x32xf32>
    %132 = arith.mulf %128, %127 : vector<2x32xf32>
    %133 = arith.addf %131, %132 : vector<2x32xf32>
    %134 = math.tanh %133 : vector<2x32xf32>
    %135 = arith.mulf %130, %134 : vector<2x32xf32>
    %136 = vector.extract_strided_slice %13 {offsets = [6, 0, 0], sizes = [1, 2, 128], strides = [1, 1, 1]} : vector<8x2x128xf32> to vector<1x2x128xf32>
    %137 = vector.shape_cast %136 : vector<1x2x128xf32> to vector<2x128xf32>
    %cst_29 = arith.constant dense<0.000000e+00> : vector<2x128xf32>
    %138 = tpu.matmul %135, %1, %cst_29 {dimension_numbers = #tpu.dot_dimension_numbers<[1], [0], [0], [1], [0, 0, 1, 1], [], []>} : vector<2x32xf32>, vector<32x128xf32>, vector<2x128xf32> -> vector<2x128xf32>
    %139 = arith.addf %137, %138 : vector<2x128xf32>
    %140 = vector.extract_strided_slice %139 {offsets = [0, 0], sizes = [2, 96], strides = [1, 1]} : vector<2x128xf32> to vector<2x96xf32>
    %141 = arith.negf %140 : vector<2x96xf32>
    %142 = math.exp %141 : vector<2x96xf32>
    %cst_30 = arith.constant 1.000000e+00 : f32
    %143 = vector.broadcast %cst_30 : f32 to vector<2x96xf32>
    %144 = arith.addf %143, %142 : vector<2x96xf32>
    %145 = arith.divf %143, %144 : vector<2x96xf32>
    %146 = vector.extract_strided_slice %139 {offsets = [0, 96], sizes = [2, 32], strides = [1, 1]} : vector<2x128xf32> to vector<2x32xf32>
    %147 = math.tanh %146 : vector<2x32xf32>
    %148 = vector.extract_strided_slice %145 {offsets = [0, 0], sizes = [2, 32], strides = [1, 1]} : vector<2x96xf32> to vector<2x32xf32>
    %149 = vector.extract_strided_slice %145 {offsets = [0, 32], sizes = [2, 32], strides = [1, 1]} : vector<2x96xf32> to vector<2x32xf32>
    %150 = vector.extract_strided_slice %145 {offsets = [0, 64], sizes = [2, 32], strides = [1, 1]} : vector<2x96xf32> to vector<2x32xf32>
    %151 = arith.mulf %149, %133 : vector<2x32xf32>
    %152 = arith.mulf %148, %147 : vector<2x32xf32>
    %153 = arith.addf %151, %152 : vector<2x32xf32>
    %154 = math.tanh %153 : vector<2x32xf32>
    %155 = arith.mulf %150, %154 : vector<2x32xf32>
    %156 = vector.extract_strided_slice %13 {offsets = [7, 0, 0], sizes = [1, 2, 128], strides = [1, 1, 1]} : vector<8x2x128xf32> to vector<1x2x128xf32>
    %157 = vector.shape_cast %156 : vector<1x2x128xf32> to vector<2x128xf32>
    %cst_31 = arith.constant dense<0.000000e+00> : vector<2x128xf32>
    %158 = tpu.matmul %155, %1, %cst_31 {dimension_numbers = #tpu.dot_dimension_numbers<[1], [0], [0], [1], [0, 0, 1, 1], [], []>} : vector<2x32xf32>, vector<32x128xf32>, vector<2x128xf32> -> vector<2x128xf32>
    %159 = arith.addf %157, %158 : vector<2x128xf32>
    %160 = vector.extract_strided_slice %159 {offsets = [0, 0], sizes = [2, 96], strides = [1, 1]} : vector<2x128xf32> to vector<2x96xf32>
    %161 = arith.negf %160 : vector<2x96xf32>
    %162 = math.exp %161 : vector<2x96xf32>
    %cst_32 = arith.constant 1.000000e+00 : f32
    %163 = vector.broadcast %cst_32 : f32 to vector<2x96xf32>
    %164 = arith.addf %163, %162 : vector<2x96xf32>
    %165 = arith.divf %163, %164 : vector<2x96xf32>
    %166 = vector.extract_strided_slice %159 {offsets = [0, 96], sizes = [2, 32], strides = [1, 1]} : vector<2x128xf32> to vector<2x32xf32>
    %167 = math.tanh %166 : vector<2x32xf32>
    %168 = vector.extract_strided_slice %165 {offsets = [0, 0], sizes = [2, 32], strides = [1, 1]} : vector<2x96xf32> to vector<2x32xf32>
    %169 = vector.extract_strided_slice %165 {offsets = [0, 32], sizes = [2, 32], strides = [1, 1]} : vector<2x96xf32> to vector<2x32xf32>
    %170 = vector.extract_strided_slice %165 {offsets = [0, 64], sizes = [2, 32], strides = [1, 1]} : vector<2x96xf32> to vector<2x32xf32>
    %171 = arith.mulf %169, %153 : vector<2x32xf32>
    %172 = arith.mulf %168, %167 : vector<2x32xf32>
    %173 = arith.addf %171, %172 : vector<2x32xf32>
    %174 = math.tanh %173 : vector<2x32xf32>
    %175 = arith.mulf %170, %174 : vector<2x32xf32>
    %176 = vector.extract_strided_slice %0 {offsets = [7, 0, 0], sizes = [1, 2, 1], strides = [1, 1, 1]} : vector<8x2x1xf32> to vector<1x2x1xf32>
    %177 = vector.shape_cast %176 : vector<1x2x1xf32> to vector<2x1xf32>
    %c0_33 = arith.constant 0 : index
    %c0_34 = arith.constant 0 : index
    %178 = vector.load %arg6[%c0_33, %c0_34] : memref<1x128xf32, #tpu.memory_space<vmem>>, vector<1x128xf32>
    %179 = vector.broadcast %177 : vector<2x1xf32> to vector<2x128xf32>
    %180 = vector.broadcast %178 : vector<1x128xf32> to vector<2x128xf32>
    %181 = arith.mulf %179, %180 : vector<2x128xf32>
    %c0_35 = arith.constant 0 : index
    %c0_36 = arith.constant 0 : index
    %182 = vector.load %arg8[%c0_35, %c0_36] : memref<1x128xf32, #tpu.memory_space<vmem>>, vector<1x128xf32>
    %183 = vector.broadcast %182 : vector<1x128xf32> to vector<2x128xf32>
    %184 = arith.addf %181, %183 : vector<2x128xf32>
    %cst_37 = arith.constant dense<0.000000e+00> : vector<2x128xf32>
    %185 = tpu.matmul %175, %2, %cst_37 {dimension_numbers = #tpu.dot_dimension_numbers<[1], [0], [0], [1], [0, 0, 1, 1], [], []>} : vector<2x32xf32>, vector<32x128xf32>, vector<2x128xf32> -> vector<2x128xf32>
    %186 = arith.addf %184, %185 : vector<2x128xf32>
    %187 = vector.extract_strided_slice %186 {offsets = [0, 0], sizes = [2, 96], strides = [1, 1]} : vector<2x128xf32> to vector<2x96xf32>
    %188 = arith.negf %187 : vector<2x96xf32>
    %189 = math.exp %188 : vector<2x96xf32>
    %cst_38 = arith.constant 1.000000e+00 : f32
    %190 = vector.broadcast %cst_38 : f32 to vector<2x96xf32>
    %191 = arith.addf %190, %189 : vector<2x96xf32>
    %192 = arith.divf %190, %191 : vector<2x96xf32>
    %193 = vector.extract_strided_slice %186 {offsets = [0, 96], sizes = [2, 32], strides = [1, 1]} : vector<2x128xf32> to vector<2x32xf32>
    %194 = math.tanh %193 : vector<2x32xf32>
    %195 = vector.extract_strided_slice %192 {offsets = [0, 0], sizes = [2, 32], strides = [1, 1]} : vector<2x96xf32> to vector<2x32xf32>
    %196 = vector.extract_strided_slice %192 {offsets = [0, 32], sizes = [2, 32], strides = [1, 1]} : vector<2x96xf32> to vector<2x32xf32>
    %197 = vector.extract_strided_slice %192 {offsets = [0, 64], sizes = [2, 32], strides = [1, 1]} : vector<2x96xf32> to vector<2x32xf32>
    %198 = arith.mulf %196, %173 : vector<2x32xf32>
    %199 = arith.mulf %195, %194 : vector<2x32xf32>
    %200 = arith.addf %198, %199 : vector<2x32xf32>
    %201 = math.tanh %200 : vector<2x32xf32>
    %202 = arith.mulf %197, %201 : vector<2x32xf32>
    %c0_39 = arith.constant 0 : index
    %c0_40 = arith.constant 0 : index
    %c0_41 = arith.constant 0 : index
    %203 = vector.load %arg14[%c0_39, %c0_40, %c0_41] : memref<4x2x32xf32, #tpu.memory_space<vmem>>, vector<1x2x32xf32>
    %204 = vector.shape_cast %203 : vector<1x2x32xf32> to vector<2x32xf32>
    %205 = vector.shape_cast %202 : vector<2x32xf32> to vector<1x2x32xf32>
    tpu.vector_store %arg14[%c0_39, %c0_40, %c0_41], %205 {strides = array<i32>} : memref<4x2x32xf32, #tpu.memory_space<vmem>>, vector<1x2x32xf32>,
    %cst_42 = arith.constant dense<0.000000e+00> : vector<2x128xf32>
    %206 = tpu.matmul %202, %3, %cst_42 {dimension_numbers = #tpu.dot_dimension_numbers<[1], [0], [0], [1], [0, 0, 1, 1], [], []>} : vector<2x32xf32>, vector<32x128xf32>, vector<2x128xf32> -> vector<2x128xf32>
    %207 = vector.broadcast %4 : vector<1x128xf32> to vector<2x128xf32>
    %208 = arith.addf %206, %207 : vector<2x128xf32>
    %209 = vector.extract_strided_slice %208 {offsets = [0, 0], sizes = [2, 96], strides = [1, 1]} : vector<2x128xf32> to vector<2x96xf32>
    %210 = arith.negf %209 : vector<2x96xf32>
    %211 = math.exp %210 : vector<2x96xf32>
    %cst_43 = arith.constant 1.000000e+00 : f32
    %212 = vector.broadcast %cst_43 : f32 to vector<2x96xf32>
    %213 = arith.addf %212, %211 : vector<2x96xf32>
    %214 = arith.divf %212, %213 : vector<2x96xf32>
    %215 = vector.extract_strided_slice %208 {offsets = [0, 96], sizes = [2, 32], strides = [1, 1]} : vector<2x128xf32> to vector<2x32xf32>
    %216 = math.tanh %215 : vector<2x32xf32>
    %217 = vector.extract_strided_slice %214 {offsets = [0, 0], sizes = [2, 32], strides = [1, 1]} : vector<2x96xf32> to vector<2x32xf32>
    %218 = vector.extract_strided_slice %214 {offsets = [0, 32], sizes = [2, 32], strides = [1, 1]} : vector<2x96xf32> to vector<2x32xf32>
    %219 = vector.extract_strided_slice %214 {offsets = [0, 64], sizes = [2, 32], strides = [1, 1]} : vector<2x96xf32> to vector<2x32xf32>
    %220 = arith.mulf %218, %200 : vector<2x32xf32>
    %221 = arith.mulf %217, %216 : vector<2x32xf32>
    %222 = arith.addf %220, %221 : vector<2x32xf32>
    %223 = math.tanh %222 : vector<2x32xf32>
    %224 = arith.mulf %219, %223 : vector<2x32xf32>
    %c1 = arith.constant 1 : index
    %c0_44 = arith.constant 0 : index
    %c0_45 = arith.constant 0 : index
    %225 = vector.load %arg14[%c1, %c0_44, %c0_45] : memref<4x2x32xf32, #tpu.memory_space<vmem>>, vector<1x2x32xf32>
    %226 = vector.shape_cast %225 : vector<1x2x32xf32> to vector<2x32xf32>
    %227 = vector.shape_cast %224 : vector<2x32xf32> to vector<1x2x32xf32>
    tpu.vector_store %arg14[%c1, %c0_44, %c0_45], %227 {strides = array<i32>} : memref<4x2x32xf32, #tpu.memory_space<vmem>>, vector<1x2x32xf32>,
    %cst_46 = arith.constant dense<0.000000e+00> : vector<2x128xf32>
    %228 = tpu.matmul %224, %3, %cst_46 {dimension_numbers = #tpu.dot_dimension_numbers<[1], [0], [0], [1], [0, 0, 1, 1], [], []>} : vector<2x32xf32>, vector<32x128xf32>, vector<2x128xf32> -> vector<2x128xf32>
    %229 = vector.broadcast %4 : vector<1x128xf32> to vector<2x128xf32>
    %230 = arith.addf %228, %229 : vector<2x128xf32>
    %231 = vector.extract_strided_slice %230 {offsets = [0, 0], sizes = [2, 96], strides = [1, 1]} : vector<2x128xf32> to vector<2x96xf32>
    %232 = arith.negf %231 : vector<2x96xf32>
    %233 = math.exp %232 : vector<2x96xf32>
    %cst_47 = arith.constant 1.000000e+00 : f32
    %234 = vector.broadcast %cst_47 : f32 to vector<2x96xf32>
    %235 = arith.addf %234, %233 : vector<2x96xf32>
    %236 = arith.divf %234, %235 : vector<2x96xf32>
    %237 = vector.extract_strided_slice %230 {offsets = [0, 96], sizes = [2, 32], strides = [1, 1]} : vector<2x128xf32> to vector<2x32xf32>
    %238 = math.tanh %237 : vector<2x32xf32>
    %239 = vector.extract_strided_slice %236 {offsets = [0, 0], sizes = [2, 32], strides = [1, 1]} : vector<2x96xf32> to vector<2x32xf32>
    %240 = vector.extract_strided_slice %236 {offsets = [0, 32], sizes = [2, 32], strides = [1, 1]} : vector<2x96xf32> to vector<2x32xf32>
    %241 = vector.extract_strided_slice %236 {offsets = [0, 64], sizes = [2, 32], strides = [1, 1]} : vector<2x96xf32> to vector<2x32xf32>
    %242 = arith.mulf %240, %222 : vector<2x32xf32>
    %243 = arith.mulf %239, %238 : vector<2x32xf32>
    %244 = arith.addf %242, %243 : vector<2x32xf32>
    %245 = math.tanh %244 : vector<2x32xf32>
    %246 = arith.mulf %241, %245 : vector<2x32xf32>
    %c2 = arith.constant 2 : index
    %c0_48 = arith.constant 0 : index
    %c0_49 = arith.constant 0 : index
    %247 = vector.load %arg14[%c2, %c0_48, %c0_49] : memref<4x2x32xf32, #tpu.memory_space<vmem>>, vector<1x2x32xf32>
    %248 = vector.shape_cast %247 : vector<1x2x32xf32> to vector<2x32xf32>
    %249 = vector.shape_cast %246 : vector<2x32xf32> to vector<1x2x32xf32>
    tpu.vector_store %arg14[%c2, %c0_48, %c0_49], %249 {strides = array<i32>} : memref<4x2x32xf32, #tpu.memory_space<vmem>>, vector<1x2x32xf32>,
    %cst_50 = arith.constant dense<0.000000e+00> : vector<2x128xf32>
    %250 = tpu.matmul %246, %3, %cst_50 {dimension_numbers = #tpu.dot_dimension_numbers<[1], [0], [0], [1], [0, 0, 1, 1], [], []>} : vector<2x32xf32>, vector<32x128xf32>, vector<2x128xf32> -> vector<2x128xf32>
    %251 = vector.broadcast %4 : vector<1x128xf32> to vector<2x128xf32>
    %252 = arith.addf %250, %251 : vector<2x128xf32>
    %253 = vector.extract_strided_slice %252 {offsets = [0, 0], sizes = [2, 96], strides = [1, 1]} : vector<2x128xf32> to vector<2x96xf32>
    %254 = arith.negf %253 : vector<2x96xf32>
    %255 = math.exp %254 : vector<2x96xf32>
    %cst_51 = arith.constant 1.000000e+00 : f32
    %256 = vector.broadcast %cst_51 : f32 to vector<2x96xf32>
    %257 = arith.addf %256, %255 : vector<2x96xf32>
    %258 = arith.divf %256, %257 : vector<2x96xf32>
    %259 = vector.extract_strided_slice %252 {offsets = [0, 96], sizes = [2, 32], strides = [1, 1]} : vector<2x128xf32> to vector<2x32xf32>
    %260 = math.tanh %259 : vector<2x32xf32>
    %261 = vector.extract_strided_slice %258 {offsets = [0, 0], sizes = [2, 32], strides = [1, 1]} : vector<2x96xf32> to vector<2x32xf32>
    %262 = vector.extract_strided_slice %258 {offsets = [0, 32], sizes = [2, 32], strides = [1, 1]} : vector<2x96xf32> to vector<2x32xf32>
    %263 = vector.extract_strided_slice %258 {offsets = [0, 64], sizes = [2, 32], strides = [1, 1]} : vector<2x96xf32> to vector<2x32xf32>
    %264 = arith.mulf %262, %244 : vector<2x32xf32>
    %265 = arith.mulf %261, %260 : vector<2x32xf32>
    %266 = arith.addf %264, %265 : vector<2x32xf32>
    %267 = math.tanh %266 : vector<2x32xf32>
    %268 = arith.mulf %263, %267 : vector<2x32xf32>
    %c3 = arith.constant 3 : index
    %c0_52 = arith.constant 0 : index
    %c0_53 = arith.constant 0 : index
    %269 = vector.load %arg14[%c3, %c0_52, %c0_53] : memref<4x2x32xf32, #tpu.memory_space<vmem>>, vector<1x2x32xf32>
    %270 = vector.shape_cast %269 : vector<1x2x32xf32> to vector<2x32xf32>
    %271 = vector.shape_cast %268 : vector<2x32xf32> to vector<1x2x32xf32>
    tpu.vector_store %arg14[%c3, %c0_52, %c0_53], %271 {strides = array<i32>} : memref<4x2x32xf32, #tpu.memory_space<vmem>>, vector<1x2x32xf32>,
    %c0_54 = arith.constant 0 : index
    %c0_55 = arith.constant 0 : index
    %c0_56 = arith.constant 0 : index
    %272 = vector.load %arg14[%c0_54, %c0_55, %c0_56] : memref<4x2x32xf32, #tpu.memory_space<vmem>>, vector<4x2x32xf32>
    %c0_57 = arith.constant 0 : index
    %c0_58 = arith.constant 0 : index
    %273 = vector.load %arg11[%c0_57, %c0_58] : memref<1x32xf32, #tpu.memory_space<vmem>>, vector<1x32xf32>
    %274 = vector.shape_cast %273 : vector<1x32xf32> to vector<1x1x32xf32>
    %275 = vector.broadcast %274 : vector<1x1x32xf32> to vector<4x2x32xf32>
    %276 = arith.mulf %272, %275 : vector<4x2x32xf32>
    %cst_59 = arith.constant dense<0.000000e+00> : vector<4x2xf32>
    %277 = vector.multi_reduction <add>, %276, %cst_59 [2] : vector<4x2x32xf32> to vector<4x2xf32>
    %c0_60 = arith.constant 0 : index
    %c0_61 = arith.constant 0 : index
    %278 = vector.load %arg12[%c0_60, %c0_61] : memref<1x1xf32, #tpu.memory_space<vmem>>, vector<1x1xf32>
    %279 = vector.broadcast %278 : vector<1x1xf32> to vector<4x2xf32>
    %280 = arith.addf %277, %279 : vector<4x2xf32>
    %c0_62 = arith.constant 0 : index
    %c0_63 = arith.constant 0 : index
    %281 = vector.load %arg13[%c0_62, %c0_63] : memref<4x2xf32, #tpu.memory_space<vmem>>, vector<4x2xf32>
    tpu.vector_store %arg13[%c0_62, %c0_63], %280 {strides = array<i32>} : memref<4x2xf32, #tpu.memory_space<vmem>>, vector<4x2xf32>,
    return
  }
}

</mosaic_0001>

<bundles_post_ra>
// kernel: seq2seq_forward.1
= control target key start
LH: loop header
LB: loop body
LE: loop exit
PB: predicated region body
PF: predicated region fallthrough
CT: control target
= control target key end

     0   :  { %v1851_v0 = vmov 0.0|0.0   ;;  %vm1852_vm0 = vmmov 0   ;;  %v1853_v4 = vmov 0.0   ;;  %v1854_v7 = vmov 0   ;;  %s1856_s24 = smov 64   ;;  %s2174_s2 = inlined_call_operand.vmem [shape: f32[32,128], index: 2, kind: input, shape index: {}]   ;;  %s2175_s0 = inlined_call_operand.vmem [shape: f32[8,2,1], index: 0, kind: input, shape index: {}]   ;;  %s2176_s5 = inlined_call_operand.vmem [shape: f32[2,32], index: 5, kind: input, shape index: {}]   ;;  %s2177_s4 = inlined_call_operand.vmem [shape: f32[2,32], index: 4, kind: input, shape index: {}]   ;;  %s2178_s1 = inlined_call_operand.vmem [shape: f32[1,128], index: 1, kind: input, shape index: {}]   ;;  %s2179_s3 = inlined_call_operand.vmem [shape: f32[1,128], index: 3, kind: input, shape index: {}]   ;;  %s2180_s7 = inlined_call_operand.vmem [shape: f32[32,128], index: 7, kind: input, shape index: {}]   ;;  %s2181_s6 = inlined_call_operand.vmem [shape: f32[1,128], index: 6, kind: input, shape index: {}]   ;;  %s2182_s8 = inlined_call_operand.vmem [shape: f32[1,128], index: 8, kind: input, shape index: {}]   ;;  %s2183_s9 = inlined_call_operand.vmem [shape: f32[32,128], index: 9, kind: input, shape index: {}]   ;;  %s2184_s10 = inlined_call_operand.vmem [shape: f32[1,128], index: 10, kind: input, shape index: {}]   ;;  %s2185_s12 = inlined_call_operand.<no memory space> [shape: f32[1,1], index: 12, kind: input, shape index: {}]   ;;  %s2186_s11 = inlined_call_operand.vmem [shape: f32[1,32], index: 11, kind: input, shape index: {}]   ;;  %s2187_s13 = inlined_call_operand.vmem [shape: f32[4,2], index: 13, kind: output, shape index: {}]  }
   0x1   :  { %1675 = vmatprep.subr.bf16.mxu0 %v1851_v0  ;;  %v54_v1 = vld [vmem:[%s2174_s2] sm:$0xff]  ;;  %v55_v2 = vld [vmem:[%s2174_s2 + $0x8] sm:$0xff]  ;;  %v56_v3 = vld [vmem:[%s2174_s2 + $0x10] sm:$0xff]  ;;  %1551 = vmatprep.mubr.msk.f32.mxu0 %vm1852_vm0, %v1853_v4  ;;  %vm139_vm1 = vcmask 261120   ;;  %vm1062_vm2 = vcmask 254976   ;;  %vm1439_vm3 = vcmask 1041409  }
   0x2   :  { %v1939_v5 = vpack.c.bf16 %v55_v2, %v54_v1  ;;  %v57_v6 = vld [vmem:[%s2174_s2 + $0x18] sm:$0xff]  ;;  %1753 = vset.pattern.permute.xlu0 %v1854_v7  ;;  %v46_v8 = vld [vmem:[%s2175_s0] sm:$0x3]  ;;  %1681 = vmatprep.subr.bf16.mxu1 %v1851_v0  ;;  %s1855_s2 = smov 32   ;;  %v47_v32 = vld [vmem:[%s2175_s0 + $0x2] sm:$0x3] }
   0x3   :  { %70 = vperm.xlu0 %1753, %v46_v8   ;;  %v138_v9 = vld [vmem:[%s2176_s5] sm:$0x3]  ;;  %1562 = vmatprep.mubr.msk.f32.mxu1 %vm1852_vm0, %v1853_v4  ;;  %v1954_v10 = vpack.c.bf16 %v57_v6, %v56_v3  ;;  %v48_v53 = vld [vmem:[%s2175_s0 + $0x4] sm:$0x3]  ;;  %vm1441_vm4 = vcmask 1042434   ;;  %vm1443_vm5 = vcmask 1043459  }
   0x4   :  { %1677 = vmatpush3.bf16.msra.mxu0 %v1939_v5  ;;  %222 = vrot.lane.b32.xlu1 %v138_v9, %s1855_s2  ;;  %v137_v11 = vld [vmem:[%s2177_s4] sm:$0x3]  ;;  %vm1446_vm6 = vcmask 11264  }
   0x5   :  { %1678 = vmatprep.subr.bf16.mxu0 %v1851_v0  ;;  %1683 = vmatpush3.bf16.msra.mxu1 %v1939_v5  ;;  %v1977_v12 = vld [vmem:[%s2178_s1] ss:$0 sm:$0xff] }
   0x6   :  { %1684 = vmatprep.subr.bf16.mxu1 %v1851_v0  ;;  %1754 = vset.pattern.permute.xlu1 %v1854_v7  ;;  %v1983_v15 = vld [vmem:[%s2179_s3] ss:$0 sm:$0xff] }
   0x8   :  { %1680 = vmatpush3.bf16.msra.mxu0 %v1954_v10 }
   0x9   :  { %1686 = vmatpush3.bf16.msra.mxu1 %v1954_v10  ;;  %1687 = vmatprep.subr.bf16.mxu0 %v1851_v0 }
   0xa   :  { %1693 = vmatprep.subr.bf16.mxu1 %v1851_v0 }
   0xb   :  { %1552 = vmatmul.mubr.msk.f32.vlgmr.msra.gmra.mrb[0].mxu0 %vm139_vm1, %v137_v11 }
   0xc   :  { %1689 = vmatpush3.bf16.msra.mxu0 %v1939_v5  ;;  %1573 = vmatprep.mubr.msk.f32.mxu0 %vm1852_vm0, %v1853_v4 }
   0xd   :  { %1690 = vmatprep.subr.bf16.mxu0 %v1851_v0 }
  0x10   :  { %1692 = vmatpush3.bf16.msra.mxu0 %v1954_v10 }
  0x11   :  { %1699 = vmatprep.subr.bf16.mxu0 %v1851_v0 }
  0x76   :  { %v223_v27 = vpop.permute.xlu1 %222 }
  0x82   :  { %v71_v13 = vpop.permute.xlu0 %70 }
  0x83   :  { %v114_v14 = vmul.f32 %v1977_v12, %v71_v13 }
  0x85   :  { %v129_v16 = vadd.f32 %v1983_v15, %v114_v14 }
  0xde   :  { %v209_v17 = vpop.f32.mrb[0].mxu0 }
  0xdf   :  { %v213_v18 = vadd.f32 %v209_v17, %v129_v16  ;;  %v1553_v19 = vpop.f32.mrb[1].mxu0  ;;  %v49_v16 = vld [vmem:[%s2175_s0 + $0x6] sm:$0x3] }
  0xe1   :  { %1755 = vtanh.f32 %v213_v18  ;;  %v1455_v21 = vmul.f32 -1.442695, %v213_v18 }
  0xe3   :  { %1757 = vpow2.f32 %v1455_v21 }
  0xeb   :  { %v1756_v20 = vpop.eup %1755 }
  0xec   :  { %227 = vrot.lane.b32.xlu0 %v1756_v20, %s1855_s2 }
  0xed   :  { %v1758_v22 = vpop.eup %1757 }
  0xee   :  { %v217_v23 = vadd.f32 1.0, %v1758_v22 }
  0xf0   :  { %1759 = vrcp.f32 %v217_v23 }
  0xfa   :  { %v1760_v24 = vpop.eup %1759 }
  0xfb   :  { %v225_v28 = vmul.f32 %v1760_v24, %v223_v27 }
 0x15e   :  { %v228_v25 = vpop.permute.xlu0 %227 }
 0x15f   :  { %v230_v26 = vmul.f32 %v1760_v24, %v228_v25 }
 0x161   :  { %232 = vrot.lane.b32.xlu1 %v230_v26, %s1855_s2 }
 0x1d3   :  { %v233_v29 = vpop.permute.xlu1 %232 }
 0x1d4   :  { %v235_v30 = vadd.f32 %v233_v29, %v225_v28 }
 0x1d6   :  { %1761 = vtanh.f32 %v235_v30 }
 0x1e0   :  { %v1762_v31 = vpop.eup %1761 }
 0x1e1   :  { %238 = vrot.lane.b32.xlu0 %v1762_v31, %s1855_s2 }
 0x1e5   :  { %75 = vperm.xlu0 %1753, %v47_v32  }
 0x253   :  { %v239_v33 = vpop.permute.xlu0 %238 }
 0x254   :  { %v241_v34 = vmul.f32 %v1760_v24, %v239_v33 }
 0x256   :  { %243 = vrot.lane.b32.xlu1 %v241_v34, %s1856_s24 }
 0x264   :  { %v76_v36 = vpop.permute.xlu0 %75 }
 0x265   :  { %v115_v37 = vmul.f32 %v1977_v12, %v76_v36 }
 0x267   :  { %v130_v38 = vadd.f32 %v1983_v15, %v115_v37  ;;  %v50_v37 = vld [vmem:[%s2175_s0 + $0x8] sm:$0x3] }
 0x2c8   :  { %v244_v35 = vpop.permute.xlu1 %243 }
 0x2c9   :  { %1563 = vmatmul.mubr.msk.f32.vlgmr.msra.gmra.mrb[0].mxu1 %vm139_vm1, %v244_v35 }
 0x2ca   :  { %1695 = vmatpush3.bf16.msra.mxu1 %v1939_v5  ;;  %1584 = vmatprep.mubr.msk.f32.mxu1 %vm1852_vm0, %v1853_v4 }
 0x2cb   :  { %1696 = vmatprep.subr.bf16.mxu1 %v1851_v0 }
 0x2ce   :  { %1698 = vmatpush3.bf16.msra.mxu1 %v1954_v10 }
 0x2cf   :  { %1705 = vmatprep.subr.bf16.mxu1 %v1851_v0 }
 0x39c   :  { %v313_v39 = vpop.f32.mrb[0].mxu1 }
 0x39d   :  { %v317_v40 = vadd.f32 %v313_v39, %v130_v38  ;;  %v1564_v41 = vpop.f32.mrb[1].mxu1 }
 0x39f   :  { %1763 = vtanh.f32 %v317_v40  ;;  %v1457_v43 = vmul.f32 -1.442695, %v317_v40 }
 0x3a1   :  { %1765 = vpow2.f32 %v1457_v43 }
 0x3a9   :  { %v1764_v42 = vpop.eup %1763 }
 0x3aa   :  { %327 = vrot.lane.b32.xlu1 %v1764_v42, %s1855_s2 }
 0x3ab   :  { %v1766_v44 = vpop.eup %1765 }
 0x3ac   :  { %v321_v45 = vadd.f32 1.0, %v1766_v44 }
 0x3ae   :  { %1767 = vrcp.f32 %v321_v45 }
 0x3b8   :  { %v1768_v46 = vpop.eup %1767 }
 0x3b9   :  { %v325_v49 = vmul.f32 %v1768_v46, %v235_v30 }
 0x41c   :  { %v328_v47 = vpop.permute.xlu1 %327 }
 0x41d   :  { %v330_v48 = vmul.f32 %v1768_v46, %v328_v47 }
 0x41f   :  { %332 = vrot.lane.b32.xlu0 %v330_v48, %s1855_s2 }
 0x491   :  { %v333_v50 = vpop.permute.xlu0 %332 }
 0x492   :  { %v335_v51 = vadd.f32 %v333_v50, %v325_v49 }
 0x494   :  { %1769 = vtanh.f32 %v335_v51 }
 0x49e   :  { %v1770_v52 = vpop.eup %1769 }
 0x49f   :  { %338 = vrot.lane.b32.xlu1 %v1770_v52, %s1855_s2 }
 0x4a3   :  { %80 = vperm.xlu1 %1754, %v48_v53  }
 0x511   :  { %v339_v54 = vpop.permute.xlu1 %338 }
 0x512   :  { %v341_v55 = vmul.f32 %v1768_v46, %v339_v54 }
 0x514   :  { %343 = vrot.lane.b32.xlu0 %v341_v55, %s1856_s24 }
 0x522   :  { %v81_v57 = vpop.permute.xlu1 %80 }
 0x523   :  { %v116_v58 = vmul.f32 %v1977_v12, %v81_v57 }
 0x525   :  { %v131_v59 = vadd.f32 %v1983_v15, %v116_v58  ;;  %v51_v58 = vld [vmem:[%s2175_s0 + $0xa] sm:$0x3] }
 0x586   :  { %v344_v56 = vpop.permute.xlu0 %343 }
 0x587   :  { %1574 = vmatmul.mubr.msk.f32.vlgmr.msra.gmra.mrb[2].mxu0 %vm139_vm1, %v344_v56 }
 0x588   :  { %1701 = vmatpush3.bf16.msra.mxu0 %v1939_v5  ;;  %1595 = vmatprep.mubr.msk.f32.mxu0 %vm1852_vm0, %v1853_v4 }
 0x589   :  { %1702 = vmatprep.subr.bf16.mxu0 %v1851_v0 }
 0x58c   :  { %1704 = vmatpush3.bf16.msra.mxu0 %v1954_v10 }
 0x58d   :  { %1711 = vmatprep.subr.bf16.mxu0 %v1851_v0 }
 0x65a   :  { %v413_v60 = vpop.f32.mrb[2].mxu0 }
 0x65b   :  { %v417_v61 = vadd.f32 %v413_v60, %v131_v59  ;;  %v1575_v62 = vpop.f32.mrb[3].mxu0 }
 0x65d   :  { %1771 = vtanh.f32 %v417_v61  ;;  %v1459_v1 = vmul.f32 -1.442695, %v417_v61 }
 0x65f   :  { %1773 = vpow2.f32 %v1459_v1 }
 0x667   :  { %v1772_v63 = vpop.eup %1771 }
 0x668   :  { %427 = vrot.lane.b32.xlu0 %v1772_v63, %s1855_s2 }
 0x669   :  { %v1774_v2 = vpop.eup %1773 }
 0x66a   :  { %v421_v3 = vadd.f32 1.0, %v1774_v2 }
 0x66c   :  { %1775 = vrcp.f32 %v421_v3 }
 0x676   :  { %v1776_v6 = vpop.eup %1775 }
 0x677   :  { %v425_v9 = vmul.f32 %v1776_v6, %v335_v51 }
 0x6da   :  { %v428_v7 = vpop.permute.xlu0 %427 }
 0x6db   :  { %v430_v8 = vmul.f32 %v1776_v6, %v428_v7 }
 0x6dd   :  { %432 = vrot.lane.b32.xlu1 %v430_v8, %s1855_s2 }
 0x74f   :  { %v433_v11 = vpop.permute.xlu1 %432 }
 0x750   :  { %v435_v13 = vadd.f32 %v433_v11, %v425_v9 }
 0x752   :  { %1777 = vtanh.f32 %v435_v13 }
 0x75c   :  { %v1778_v14 = vpop.eup %1777 }
 0x75d   :  { %438 = vrot.lane.b32.xlu0 %v1778_v14, %s1855_s2 }
 0x761   :  { %85 = vperm.xlu0 %1753, %v49_v16  }
 0x7cf   :  { %v439_v17 = vpop.permute.xlu0 %438 }
 0x7d0   :  { %v441_v18 = vmul.f32 %v1776_v6, %v439_v17 }
 0x7d2   :  { %443 = vrot.lane.b32.xlu1 %v441_v18, %s1856_s24 }
 0x7e0   :  { %v86_v20 = vpop.permute.xlu0 %85 }
 0x7e1   :  { %v117_v21 = vmul.f32 %v1977_v12, %v86_v20 }
 0x7e3   :  { %v132_v22 = vadd.f32 %v1983_v15, %v117_v21 }
 0x844   :  { %v444_v19 = vpop.permute.xlu1 %443 }
 0x845   :  { %1585 = vmatmul.mubr.msk.f32.vlgmr.msra.gmra.mrb[2].mxu1 %vm139_vm1, %v444_v19  ;;  %v52_v19 = vld [vmem:[%s2175_s0 + $0xc] sm:$0x3] }
 0x846   :  { %1707 = vmatpush3.bf16.msra.mxu1 %v1939_v5  ;;  %1606 = vmatprep.mubr.msk.f32.mxu1 %vm1852_vm0, %v1853_v4 }
 0x847   :  { %1708 = vmatprep.subr.bf16.mxu1 %v1851_v0 }
 0x84a   :  { %1710 = vmatpush3.bf16.msra.mxu1 %v1954_v10 }
 0x84b   :  { %1717 = vmatprep.subr.bf16.mxu1 %v1851_v0 }
 0x918   :  { %v513_v23 = vpop.f32.mrb[2].mxu1 }
 0x919   :  { %v517_v24 = vadd.f32 %v513_v23, %v132_v22  ;;  %v1586_v25 = vpop.f32.mrb[3].mxu1 }
 0x91b   :  { %1779 = vtanh.f32 %v517_v24  ;;  %v1461_v27 = vmul.f32 -1.442695, %v517_v24 }
 0x91d   :  { %1781 = vpow2.f32 %v1461_v27 }
 0x925   :  { %v1780_v26 = vpop.eup %1779 }
 0x926   :  { %527 = vrot.lane.b32.xlu1 %v1780_v26, %s1855_s2 }
 0x927   :  { %v1782_v28 = vpop.eup %1781 }
 0x928   :  { %v521_v29 = vadd.f32 1.0, %v1782_v28 }
 0x92a   :  { %1783 = vrcp.f32 %v521_v29 }
 0x934   :  { %v1784_v30 = vpop.eup %1783 }
 0x935   :  { %v525_v33 = vmul.f32 %v1784_v30, %v435_v13 }
 0x998   :  { %v528_v31 = vpop.permute.xlu1 %527 }
 0x999   :  { %v530_v32 = vmul.f32 %v1784_v30, %v528_v31 }
 0x99b   :  { %532 = vrot.lane.b32.xlu0 %v530_v32, %s1855_s2 }
 0xa0d   :  { %v533_v34 = vpop.permute.xlu0 %532 }
 0xa0e   :  { %v535_v35 = vadd.f32 %v533_v34, %v525_v33 }
 0xa10   :  { %1785 = vtanh.f32 %v535_v35 }
 0xa1a   :  { %v1786_v36 = vpop.eup %1785 }
 0xa1b   :  { %538 = vrot.lane.b32.xlu1 %v1786_v36, %s1855_s2 }
 0xa1f   :  { %90 = vperm.xlu1 %1754, %v50_v37  }
 0xa8d   :  { %v539_v38 = vpop.permute.xlu1 %538 }
 0xa8e   :  { %v541_v39 = vmul.f32 %v1784_v30, %v539_v38 }
 0xa90   :  { %543 = vrot.lane.b32.xlu0 %v541_v39, %s1856_s24 }
 0xa9e   :  { %v91_v41 = vpop.permute.xlu1 %90 }
 0xa9f   :  { %v118_v42 = vmul.f32 %v1977_v12, %v91_v41 }
 0xaa1   :  { %v133_v43 = vadd.f32 %v1983_v15, %v118_v42 }
 0xb02   :  { %v544_v40 = vpop.permute.xlu0 %543 }
 0xb03   :  { %1596 = vmatmul.mubr.msk.f32.vlgmr.msra.gmra.mrb[4].mxu0 %vm139_vm1, %v544_v40  ;;  %v53_v40 = vld [vmem:[%s2175_s0 + $0xe] sm:$0x3] }
 0xb04   :  { %1713 = vmatpush3.bf16.msra.mxu0 %v1939_v5  ;;  %1617 = vmatprep.mubr.msk.f32.mxu0 %vm1852_vm0, %v1853_v4 }
 0xb05   :  { %1714 = vmatprep.subr.bf16.mxu0 %v1851_v0 }
 0xb08   :  { %1716 = vmatpush3.bf16.msra.mxu0 %v1954_v10 }
 0xb09   :  { %1723 = vmatprep.subr.bf16.mxu0 %v1851_v0 }
 0xbd6   :  { %v613_v44 = vpop.f32.mrb[4].mxu0 }
 0xbd7   :  { %v617_v45 = vadd.f32 %v613_v44, %v133_v43  ;;  %v1597_v46 = vpop.f32.mrb[5].mxu0 }
 0xbd9   :  { %1787 = vtanh.f32 %v617_v45  ;;  %v1463_v48 = vmul.f32 -1.442695, %v617_v45 }
 0xbdb   :  { %1789 = vpow2.f32 %v1463_v48 }
 0xbe3   :  { %v1788_v47 = vpop.eup %1787 }
 0xbe4   :  { %627 = vrot.lane.b32.xlu0 %v1788_v47, %s1855_s2 }
 0xbe5   :  { %v1790_v49 = vpop.eup %1789 }
 0xbe6   :  { %v621_v50 = vadd.f32 1.0, %v1790_v49 }
 0xbe8   :  { %1791 = vrcp.f32 %v621_v50 }
 0xbf2   :  { %v1792_v51 = vpop.eup %1791 }
 0xbf3   :  { %v625_v54 = vmul.f32 %v1792_v51, %v535_v35 }
 0xc56   :  { %v628_v52 = vpop.permute.xlu0 %627 }
 0xc57   :  { %v630_v53 = vmul.f32 %v1792_v51, %v628_v52 }
 0xc59   :  { %632 = vrot.lane.b32.xlu1 %v630_v53, %s1855_s2 }
 0xccb   :  { %v633_v55 = vpop.permute.xlu1 %632 }
 0xccc   :  { %v635_v56 = vadd.f32 %v633_v55, %v625_v54 }
 0xcce   :  { %1793 = vtanh.f32 %v635_v56 }
 0xcd8   :  { %v1794_v57 = vpop.eup %1793 }
 0xcd9   :  { %638 = vrot.lane.b32.xlu0 %v1794_v57, %s1855_s2 }
 0xcdd   :  { %95 = vperm.xlu0 %1753, %v51_v58   ;;  %v58_v58 = vld [vmem:[%s2180_s7] sm:$0xff] }
 0xd4b   :  { %v639_v59 = vpop.permute.xlu0 %638 }
 0xd4c   :  { %v641_v60 = vmul.f32 %v1792_v51, %v639_v59  ;;  %v59_v59 = vld [vmem:[%s2180_s7 + $0x8] sm:$0xff] }
 0xd4e   :  { %643 = vrot.lane.b32.xlu1 %v641_v60, %s1856_s24  ;;  %v60_v60 = vld [vmem:[%s2180_s7 + $0x10] sm:$0xff] }
 0xd5c   :  { %v96_v62 = vpop.permute.xlu0 %95 }
 0xd5d   :  { %v119_v63 = vmul.f32 %v1977_v12, %v96_v62  ;;  %v61_v62 = vld [vmem:[%s2180_s7 + $0x18] sm:$0xff] }
 0xd5f   :  { %v134_v1 = vadd.f32 %v1983_v15, %v119_v63  ;;  %v1727_v63 = vpack.c.bf16 %v61_v62, %v60_v60 }
 0xdc0   :  { %v644_v61 = vpop.permute.xlu1 %643 }
 0xdc1   :  { %1607 = vmatmul.mubr.msk.f32.vlgmr.msra.gmra.mrb[4].mxu1 %vm139_vm1, %v644_v61  ;;  %v1724_v61 = vpack.c.bf16 %v59_v59, %v58_v58 }
 0xdc2   :  { %1719 = vmatpush3.bf16.msra.mxu1 %v1939_v5  ;;  %1628 = vmatprep.mubr.msk.f32.mxu1 %vm1852_vm0, %v1853_v4 }
 0xdc3   :  { %1720 = vmatprep.subr.bf16.mxu1 %v1851_v0 }
 0xdc6   :  { %1722 = vmatpush3.bf16.msra.mxu1 %v1954_v10 }
 0xdc7   :  { %1729 = vmatprep.subr.bf16.mxu1 %v1851_v0 }
 0xe94   :  { %v713_v2 = vpop.f32.mrb[4].mxu1 }
 0xe95   :  { %v717_v3 = vadd.f32 %v713_v2, %v134_v1  ;;  %v1608_v6 = vpop.f32.mrb[5].mxu1 }
 0xe97   :  { %1795 = vtanh.f32 %v717_v3  ;;  %v1465_v5 = vmul.f32 -1.442695, %v717_v3 }
 0xe99   :  { %1797 = vpow2.f32 %v1465_v5 }
 0xea1   :  { %v1796_v7 = vpop.eup %1795 }
 0xea2   :  { %727 = vrot.lane.b32.xlu1 %v1796_v7, %s1855_s2  ;;  %v1470_v7 = vld [vmem:[%s2181_s6] ss:$0 sm:$0xff] }
 0xea3   :  { %v1798_v8 = vpop.eup %1797 }
 0xea4   :  { %v721_v9 = vadd.f32 1.0, %v1798_v8  ;;  %v1471_v8 = vld [vmem:[%s2182_s8] ss:$0 sm:$0xff] }
 0xea6   :  { %1799 = vrcp.f32 %v721_v9 }
 0xeb0   :  { %v1800_v10 = vpop.eup %1799 }
 0xeb1   :  { %v725_v14 = vmul.f32 %v1800_v10, %v635_v56 }
 0xf14   :  { %v728_v11 = vpop.permute.xlu1 %727 }
 0xf15   :  { %v730_v13 = vmul.f32 %v1800_v10, %v728_v11 }
 0xf17   :  { %732 = vrot.lane.b32.xlu0 %v730_v13, %s1855_s2 }
 0xf89   :  { %v733_v16 = vpop.permute.xlu0 %732 }
 0xf8a   :  { %v735_v17 = vadd.f32 %v733_v16, %v725_v14 }
 0xf8c   :  { %1801 = vtanh.f32 %v735_v17 }
 0xf96   :  { %v1802_v18 = vpop.eup %1801 }
 0xf97   :  { %738 = vrot.lane.b32.xlu1 %v1802_v18, %s1855_s2 }
 0xf9b   :  { %100 = vperm.xlu1 %1754, %v52_v19  }
0x1009   :  { %v739_v20 = vpop.permute.xlu1 %738 }
0x100a   :  { %v741_v21 = vmul.f32 %v1800_v10, %v739_v20 }
0x100c   :  { %743 = vrot.lane.b32.xlu0 %v741_v21, %s1856_s24 }
0x101a   :  { %v101_v23 = vpop.permute.xlu1 %100 }
0x101b   :  { %v120_v24 = vmul.f32 %v1977_v12, %v101_v23 }
0x101d   :  { %v135_v25 = vadd.f32 %v1983_v15, %v120_v24 }
0x107e   :  { %v744_v22 = vpop.permute.xlu0 %743 }
0x107f   :  { %1618 = vmatmul.mubr.msk.f32.vlgmr.msra.gmra.mrb[6].mxu0 %vm139_vm1, %v744_v22 }
0x1080   :  { %1639 = vmatprep.mubr.msk.f32.mxu0 %vm1852_vm0, %v1853_v4  ;;  %1725 = vmatpush3.bf16.msra.mxu0 %v1724_v61 }
0x1081   :  { %1726 = vmatprep.subr.bf16.mxu0 %v1851_v0 }
0x1084   :  { %1728 = vmatpush3.bf16.msra.mxu0 %v1727_v63 }
0x1085   :  { %1735 = vmatprep.subr.bf16.mxu0 %v1851_v0 }
0x1152   :  { %v813_v26 = vpop.f32.mrb[6].mxu0 }
0x1153   :  { %v817_v27 = vadd.f32 %v813_v26, %v135_v25  ;;  %v1619_v28 = vpop.f32.mrb[7].mxu0  ;;  %v62_v25 = vld [vmem:[%s2183_s9] sm:$0xff]  ;;  %v63_v26 = vld [vmem:[%s2183_s9 + $0x8] sm:$0xff] }
0x1154   :  { %v1730_v28 = vpack.c.bf16 %v63_v26, %v62_v25 }
0x1155   :  { %1803 = vtanh.f32 %v817_v27  ;;  %v1467_v30 = vmul.f32 -1.442695, %v817_v27  ;;  %v64_v27 = vld [vmem:[%s2183_s9 + $0x10] sm:$0xff] }
0x1157   :  { %1805 = vpow2.f32 %v1467_v30 }
0x115f   :  { %v1804_v29 = vpop.eup %1803 }
0x1160   :  { %827 = vrot.lane.b32.xlu0 %v1804_v29, %s1855_s2  ;;  %v65_v29 = vld [vmem:[%s2183_s9 + $0x18] sm:$0xff] }
0x1161   :  { %v1806_v31 = vpop.eup %1805  ;;  %v1733_v30 = vpack.c.bf16 %v65_v29, %v64_v27 }
0x1162   :  { %v821_v32 = vadd.f32 1.0, %v1806_v31 }
0x1164   :  { %1807 = vrcp.f32 %v821_v32 }
0x116e   :  { %v1808_v33 = vpop.eup %1807 }
0x116f   :  { %v825_v36 = vmul.f32 %v1808_v33, %v735_v17 }
0x11d2   :  { %v828_v34 = vpop.permute.xlu0 %827 }
0x11d3   :  { %v830_v35 = vmul.f32 %v1808_v33, %v828_v34 }
0x11d5   :  { %832 = vrot.lane.b32.xlu1 %v830_v35, %s1855_s2  ;;  %v1474_v35 = vld [vmem:[%s2184_s10] ss:$0 sm:$0xff] }
0x1247   :  { %v833_v37 = vpop.permute.xlu1 %832 }
0x1248   :  { %v835_v38 = vadd.f32 %v833_v37, %v825_v36 }
0x124a   :  { %1809 = vtanh.f32 %v835_v38 }
0x1254   :  { %v1810_v39 = vpop.eup %1809 }
0x1255   :  { %838 = vrot.lane.b32.xlu0 %v1810_v39, %s1855_s2 }
0x1259   :  { %105 = vperm.xlu0 %1753, %v53_v40  }
0x12c7   :  { %v839_v41 = vpop.permute.xlu0 %838 }
0x12c8   :  { %v841_v42 = vmul.f32 %v1808_v33, %v839_v41 }
0x12ca   :  { %843 = vrot.lane.b32.xlu1 %v841_v42, %s1856_s24 }
0x12d8   :  { %v106_v44 = vpop.permute.xlu0 %105 }
0x12d9   :  { %v121_v45 = vmul.f32 %v1977_v12, %v106_v44  ;;  %v949_v5 = vmul.f32 %v1470_v7, %v106_v44 }
0x12db   :  { %v136_v46 = vadd.f32 %v1983_v15, %v121_v45  ;;  %v957_v9 = vadd.f32 %v1471_v8, %v949_v5 }
0x133c   :  { %v844_v43 = vpop.permute.xlu1 %843 }
0x133d   :  { %1629 = vmatmul.mubr.msk.f32.vlgmr.msra.gmra.mrb[6].mxu1 %vm139_vm1, %v844_v43 }
0x133e   :  { %1650 = vmatprep.mubr.msk.f32.mxu1 %vm1852_vm0, %v1853_v4  ;;  %1731 = vmatpush3.bf16.msra.mxu1 %v1730_v28 }
0x133f   :  { %1732 = vmatprep.subr.bf16.mxu1 %v1851_v0 }
0x1342   :  { %1734 = vmatpush3.bf16.msra.mxu1 %v1733_v30 }
0x1343   :  { %1741 = vmatprep.subr.bf16.mxu1 %v1851_v0 }
0x1410   :  { %v913_v47 = vpop.f32.mrb[6].mxu1 }
0x1411   :  { %v917_v48 = vadd.f32 %v913_v47, %v136_v46  ;;  %v1630_v49 = vpop.f32.mrb[7].mxu1 }
0x1413   :  { %1811 = vtanh.f32 %v917_v48  ;;  %v1469_v51 = vmul.f32 -1.442695, %v917_v48 }
0x1415   :  { %1813 = vpow2.f32 %v1469_v51 }
0x141d   :  { %v1812_v50 = vpop.eup %1811 }
0x141e   :  { %927 = vrot.lane.b32.xlu1 %v1812_v50, %s1855_s2 }
0x141f   :  { %v1814_v52 = vpop.eup %1813 }
0x1420   :  { %v921_v53 = vadd.f32 1.0, %v1814_v52 }
0x1422   :  { %1815 = vrcp.f32 %v921_v53 }
0x142c   :  { %v1816_v54 = vpop.eup %1815 }
0x142d   :  { %v925_v12 = vmul.f32 %v1816_v54, %v835_v38 }
0x1490   :  { %v928_v55 = vpop.permute.xlu1 %927 }
0x1491   :  { %v930_v56 = vmul.f32 %v1816_v54, %v928_v55 }
0x1493   :  { %932 = vrot.lane.b32.xlu0 %v930_v56, %s1855_s2 }
0x1505   :  { %v933_v57 = vpop.permute.xlu0 %932 }
0x1506   :  { %v935_v15 = vadd.f32 %v933_v57, %v925_v12 }
0x1508   :  { %1817 = vtanh.f32 %v935_v15 }
0x1512   :  { %v1818_v1 = vpop.eup %1817 }
0x1513   :  { %938 = vrot.lane.b32.xlu1 %v1818_v1, %s1855_s2 }
0x1585   :  { %v939_v2 = vpop.permute.xlu1 %938 }
0x1586   :  { %v941_v3 = vmul.f32 %v1816_v54, %v939_v2 }
0x1588   :  { %959 = vrot.lane.b32.xlu0 %v941_v3, %s1856_s24 }
0x15fa   :  { %v960_v6 = vpop.permute.xlu0 %959 }
0x15fb   :  { %1640 = vmatmul.mubr.msk.f32.vlgmr.msra.gmra.mrb[8].mxu0 %vm139_vm1, %v960_v6 }
0x15fc   :  { %1661 = vmatprep.mubr.msk.f32.mxu0 %vm1852_vm0, %v1853_v4  ;;  %1737 = vmatpush3.bf16.msra.mxu0 %v1730_v28 }
0x15fd   :  { %1738 = vmatprep.subr.bf16.mxu0 %v1851_v0 }
0x1600   :  { %1740 = vmatpush3.bf16.msra.mxu0 %v1733_v30 }
0x16ce   :  { %v1029_v10 = vpop.f32.mrb[8].mxu0 }
0x16cf   :  { %v1033_v11 = vadd.f32 %v1029_v10, %v957_v9  ;;  %v1641_v13 = vpop.f32.mrb[9].mxu0 }
0x16d1   :  { %1819 = vtanh.f32 %v1033_v11  ;;  %v1473_v16 = vmul.f32 -1.442695, %v1033_v11 }
0x16d3   :  { %1821 = vpow2.f32 %v1473_v16 }
0x16db   :  { %v1820_v14 = vpop.eup %1819 }
0x16dc   :  { %1043 = vrot.lane.b32.xlu1 %v1820_v14, %s1855_s2 }
0x16dd   :  { %v1822_v17 = vpop.eup %1821 }
0x16de   :  { %v1037_v18 = vadd.f32 1.0, %v1822_v17 }
0x16e0   :  { %1823 = vrcp.f32 %v1037_v18 }
0x16ea   :  { %v1824_v19 = vpop.eup %1823 }
0x16eb   :  { %v1041_v22 = vmul.f32 %v1824_v19, %v935_v15 }
0x174e   :  { %v1044_v20 = vpop.permute.xlu1 %1043 }
0x174f   :  { %v1046_v21 = vmul.f32 %v1824_v19, %v1044_v20  ;;  %v18_v20 = vstv %s2185_s12 }
0x1750   :  { %19 = vst [vmem:[#allocation3] sm:$0x1] %v18_v20 }
0x1751   :  { %1048 = vrot.lane.b32.xlu0 %v1046_v21, %s1855_s2 }
0x17c3   :  { %v1049_v23 = vpop.permute.xlu0 %1048 }
0x17c4   :  { %v1051_v24 = vadd.f32 %v1049_v23, %v1041_v22  ;;  %v1481_v22 = vld [vmem:[%s2186_s11] ss:$0 sm:$0xff] }
0x17c6   :  { %1825 = vtanh.f32 %v1051_v24 }
0x17d0   :  { %v1826_v31 = vpop.eup %1825 }
0x17d1   :  { %1054 = vrot.lane.b32.xlu1 %v1826_v31, %s1855_s2 }
0x1843   :  { %v1055_v32 = vpop.permute.xlu1 %1054 }
0x1844   :  { %v1057_v33 = vmul.f32 %v1824_v19, %v1055_v32 }
0x1846   :  { %1059 = vrot.lane.b32.xlu0 %v1057_v33, %s1856_s24  ;;  %v1482_v33 = vld [vmem:[#allocation3] ss:$0 sm:$0xff] }
0x18b8   :  { %v1060_v34 = vpop.permute.xlu0 %1059 }
0x18b9   :  { %1063 = vst.msk [vmem:[#allocation2] sm:$0x3] %vm1062_vm2, %v1060_v34  ;;  %1651 = vmatmul.mubr.msk.f32.vlgmr.msra.gmra.mrb[8].mxu1 %vm139_vm1, %v1060_v34 }
0x18ba   :  { %1743 = vmatpush3.bf16.msra.mxu1 %v1730_v28  ;;  %1672 = vmatprep.mubr.msk.f32.mxu1 %vm1852_vm0, %v1853_v4 }
0x18bb   :  { %1744 = vmatprep.subr.bf16.mxu1 %v1851_v0 }
0x18be   :  { %1746 = vmatpush3.bf16.msra.mxu1 %v1733_v30 }
0x18c0   :  { %v1376_v21 = vld [vmem:[#allocation2] sm:$0x3] }
0x18c1   :  { %v1387_v23 = vmul.f32 %v1481_v22, %v1376_v21 }
0x198c   :  { %v1138_v36 = vpop.f32.mrb[8].mxu1 }
0x198d   :  { %v1139_v37 = vadd.f32 %v1474_v35, %v1138_v36  ;;  %v1652_v38 = vpop.f32.mrb[9].mxu1 }
0x198f   :  { %1827 = vtanh.f32 %v1139_v37  ;;  %v1476_v40 = vmul.f32 -1.442695, %v1139_v37 }
0x1991   :  { %1829 = vpow2.f32 %v1476_v40 }
0x1999   :  { %v1828_v39 = vpop.eup %1827 }
0x199a   :  { %1151 = vrot.lane.b32.xlu1 %v1828_v39, %s1855_s2  ;;  %v1421_v39 = vlaneseq }
0x199b   :  { %v1830_v41 = vpop.eup %1829 }
0x199c   :  { %v1145_v42 = vadd.f32 1.0, %v1830_v41  ;;  %v1422_v41 = vand.u32 127, %v1421_v39 }
0x199e   :  { %1831 = vrcp.f32 %v1145_v42  ;;  %v1424_v42 = vshrl.u32 %v1421_v39, 7 }
0x19a8   :  { %v1832_v4 = vpop.eup %1831 }
0x19a9   :  { %v1149_v44 = vmul.f32 %v1832_v4, %v1051_v24  ;;  %v1391_v24 = vsel %vm1062_vm2, %v1387_v23, 0.0 }
0x1a0c   :  { %v1152_v43 = vpop.permute.xlu1 %1151 }
0x1a0d   :  { %v1154_v0 = vmul.f32 %v1832_v4, %v1152_v43 }
0x1a0f   :  { %1156 = vrot.lane.b32.xlu0 %v1154_v0, %s1855_s2  ;;  %v1425_v0 = vsub.s32 %v1422_v41, %v1424_v42 }
0x1a81   :  { %v1157_v45 = vpop.permute.xlu0 %1156 }
0x1a82   :  { %v1159_v46 = vadd.f32 %v1157_v45, %v1149_v44 }
0x1a84   :  { %1833 = vtanh.f32 %v1159_v46 }
0x1a8e   :  { %v1834_v47 = vpop.eup %1833 }
0x1a8f   :  { %1162 = vrot.lane.b32.xlu1 %v1834_v47, %s1855_s2 }
0x1b01   :  { %v1163_v48 = vpop.permute.xlu1 %1162 }
0x1b02   :  { %v1165_v49 = vmul.f32 %v1832_v4, %v1163_v48 }
0x1b04   :  { %1167 = vrot.lane.b32.xlu0 %v1165_v49, %s1856_s24 }
0x1b76   :  { %v1168_v50 = vpop.permute.xlu0 %1167 }
0x1b77   :  { %1171 = vst.msk [vmem:[#allocation2 + $0x2] sm:$0x3] %vm1062_vm2, %v1168_v50  ;;  %1662 = vmatmul.mubr.msk.f32.vlgmr.msra.gmra.mrb[10].mxu0 %vm139_vm1, %v1168_v50 }
0x1b7e   :  { %v1377_v27 = vld [vmem:[#allocation2 + $0x2] sm:$0x3] }
0x1b7f   :  { %v1388_v28 = vmul.f32 %v1481_v22, %v1377_v27 }
0x1b81   :  { %v1394_v30 = vsel %vm1062_vm2, %v1388_v28, 0.0 }
0x1c4a   :  { %v1240_v51 = vpop.f32.mrb[10].mxu0 }
0x1c4b   :  { %v1241_v52 = vadd.f32 %v1474_v35, %v1240_v51  ;;  %v1663_v53 = vpop.f32.mrb[11].mxu0 }
0x1c4d   :  { %1835 = vtanh.f32 %v1241_v52  ;;  %v1478_v55 = vmul.f32 -1.442695, %v1241_v52 }
0x1c4f   :  { %1837 = vpow2.f32 %v1478_v55 }
0x1c57   :  { %v1836_v54 = vpop.eup %1835 }
0x1c58   :  { %1253 = vrot.lane.b32.xlu1 %v1836_v54, %s1855_s2 }
0x1c59   :  { %v1838_v56 = vpop.eup %1837 }
0x1c5a   :  { %v1247_v12 = vadd.f32 1.0, %v1838_v56 }
0x1c5c   :  { %1839 = vrcp.f32 %v1247_v12 }
0x1c66   :  { %v1840_v57 = vpop.eup %1839 }
0x1c67   :  { %v1251_v59 = vmul.f32 %v1840_v57, %v1159_v46 }
0x1cca   :  { %v1254_v15 = vpop.permute.xlu1 %1253 }
0x1ccb   :  { %v1256_v58 = vmul.f32 %v1840_v57, %v1254_v15 }
0x1ccd   :  { %1258 = vrot.lane.b32.xlu0 %v1256_v58, %s1855_s2 }
0x1d3f   :  { %v1259_v60 = vpop.permute.xlu0 %1258 }
0x1d40   :  { %v1261_v61 = vadd.f32 %v1259_v60, %v1251_v59 }
0x1d42   :  { %1841 = vtanh.f32 %v1261_v61 }
0x1d4c   :  { %v1842_v62 = vpop.eup %1841 }
0x1d4d   :  { %1264 = vrot.lane.b32.xlu1 %v1842_v62, %s1855_s2 }
0x1dbf   :  { %v1265_v63 = vpop.permute.xlu1 %1264 }
0x1dc0   :  { %v1267_v1 = vmul.f32 %v1840_v57, %v1265_v63 }
0x1dc2   :  { %1269 = vrot.lane.b32.xlu0 %v1267_v1, %s1856_s24 }
0x1e34   :  { %v1270_v2 = vpop.permute.xlu0 %1269 }
0x1e35   :  { %1273 = vst.msk [vmem:[#allocation2 + $0x4] sm:$0x3] %vm1062_vm2, %v1270_v2  ;;  %1673 = vmatmul.mubr.msk.f32.vlgmr.msra.gmra.mrb[10].mxu1 %vm139_vm1, %v1270_v2 }
0x1e3c   :  { %v1378_v29 = vld [vmem:[#allocation2 + $0x4] sm:$0x3] }
0x1e3d   :  { %v1389_v31 = vmul.f32 %v1481_v22, %v1378_v29 }
0x1e3f   :  { %v1397_v32 = vsel %vm1062_vm2, %v1389_v31, 0.0 }
0x1f08   :  { %v1342_v3 = vpop.f32.mrb[10].mxu1 }
0x1f09   :  { %v1343_v6 = vadd.f32 %v1474_v35, %v1342_v3  ;;  %v1674_v7 = vpop.f32.mrb[11].mxu1 }
0x1f0b   :  { %1843 = vtanh.f32 %v1343_v6  ;;  %v1480_v8 = vmul.f32 -1.442695, %v1343_v6 }
0x1f0d   :  { %1845 = vpow2.f32 %v1480_v8 }
0x1f15   :  { %v1844_v5 = vpop.eup %1843 }
0x1f16   :  { %1355 = vrot.lane.b32.xlu1 %v1844_v5, %s1855_s2 }
0x1f17   :  { %v1846_v9 = vpop.eup %1845 }
0x1f18   :  { %v1349_v10 = vadd.f32 1.0, %v1846_v9 }
0x1f1a   :  { %1847 = vrcp.f32 %v1349_v10 }
0x1f24   :  { %v1848_v11 = vpop.eup %1847 }
0x1f25   :  { %v1353_v16 = vmul.f32 %v1848_v11, %v1261_v61 }
0x1f88   :  { %v1356_v13 = vpop.permute.xlu1 %1355 }
0x1f89   :  { %v1358_v14 = vmul.f32 %v1848_v11, %v1356_v13 }
0x1f8b   :  { %1360 = vrot.lane.b32.xlu0 %v1358_v14, %s1855_s2 }
0x1ffd   :  { %v1361_v17 = vpop.permute.xlu0 %1360 }
0x1ffe   :  { %v1363_v18 = vadd.f32 %v1361_v17, %v1353_v16 }
0x2000   :  { %1849 = vtanh.f32 %v1363_v18 }
0x200a   :  { %v1850_v19 = vpop.eup %1849 }
0x200b   :  { %1366 = vrot.lane.b32.xlu1 %v1850_v19, %s1855_s2 }
0x202f   :  { %1392 = vadd.xlane.f32.xlu1 %v1391_v24 }
0x207d   :  { %v1367_v25 = vpop.permute.xlu1 %1366 }
0x207e   :  { %v1369_v26 = vmul.f32 %v1848_v11, %v1367_v25 }
0x2080   :  { %1371 = vrot.lane.b32.xlu0 %v1369_v26, %s1856_s24 }
0x209f   :  { %1395 = vadd.xlane.f32.xlu0 %v1394_v30 }
0x20a3   :  { %1398 = vadd.xlane.f32.xlu0 %v1397_v32 }
0x20b9   :  { %1410 = vperm.xlu0 %1753, %v1482_v33  }
0x20bc   :  { %v1393_v43 = vpop.xlane.xlu1 %1392 }
0x20f2   :  { %v1372_v34 = vpop.permute.xlu0 %1371 }
0x20f3   :  { %1375 = vst.msk [vmem:[#allocation2 + $0x6] sm:$0x3] %vm1062_vm2, %v1372_v34 }
0x20fa   :  { %v1379_v35 = vld [vmem:[#allocation2 + $0x6] sm:$0x3] }
0x20fb   :  { %v1390_v36 = vmul.f32 %v1481_v22, %v1379_v35 }
0x20fd   :  { %v1400_v37 = vsel %vm1062_vm2, %v1390_v36, 0.0 }
0x20fe   :  { %1401 = vadd.xlane.f32.xlu1 %v1400_v37 }
0x212c   :  { %v1396_v38 = vpop.xlane.xlu0 %1395 }
0x2130   :  { %v1399_v40 = vpop.xlane.xlu0 %1398 }
0x2138   :  { %v1411_v4 = vpop.permute.xlu0 %1410 }
0x2139   :  { %v1413_v44 = vadd.f32 %v1411_v4, %v1393_v43  ;;  %v1414_v45 = vadd.f32 %v1411_v4, %v1396_v38  ;;  %v1415_v46 = vadd.f32 %v1411_v4, %v1399_v40 }
0x213b   :  { %v1426_v47 = vrot.slane %v1413_v44, %v1425_v0  ;;  %v1430_v48 = vrot.slane %v1414_v45, %v1425_v0  ;;  %v1434_v49 = vrot.slane %v1415_v46, %v1425_v0 }
0x213d   :  { %v1440_v51 = vsel %vm1439_vm3, %v1430_v48, %v1426_v47 }
0x213e   :  { %v1442_v54 = vsel %vm1441_vm4, %v1434_v49, %v1440_v51 }
0x218b   :  { %v1402_v50 = vpop.xlane.xlu1 %1401 }
0x218c   :  { %v1416_v52 = vadd.f32 %v1411_v4, %v1402_v50 }
0x218e   :  { %v1438_v53 = vrot.slane %v1416_v52, %v1425_v0 }
0x2190   :  { %v1444_v55 = vsel %vm1443_vm5, %v1438_v53, %v1442_v54 }
0x2191   :  { %1447 = vst.msk [vmem:[%s2187_s13] sm:$0xf] %vm1446_vm6, %v1444_v55 }

</bundles_post_ra>
